<compile_context>
chip_gen: v6e
topology: v6e:2x2x1
jax: 0.10.0
libtpu: 0.0.40
codegen_flags: <defaults>
</compile_context>

<pallas_src>
import functools

import jax
import jax.numpy as jnp
from jax.experimental import pallas as pl
from jax.experimental.pallas import tpu as pltpu

# ------------------------- problem sizes (demo) -----------------------------
NFRAMES = 8                     # f  (seq / frames)
BATCH = 2                       # b
LATENT_DIM = 32                 # latent_dim
NJOINTS = 8                     # n
NFEATS = 4                      # d
INPUT_FEATS = NJOINTS * NFEATS  # 32


# -------------------------------- kernels -----------------------------------
def _linear_kernel(x_ref, w_ref, b_ref, o_ref):
    """o = x @ w + b, everything resident in one VMEM block."""
    x = x_ref[...].astype(jnp.float32)
    y = jnp.dot(x, w_ref[...], preferred_element_type=jnp.float32) + b_ref[...]
    o_ref[...] = y.astype(o_ref.dtype)


def _rot_vel_kernel(x_ref, wp_ref, bp_ref, wv_ref, bv_ref, o_ref, *, n_first):
    """Rows < n_first (frame 0, i.e. the first `batch` rows of the row-major
    (frame, batch) flattening) use poseFinal; remaining rows use velFinal.
    Fused into a single invocation: two full-width matmuls + one VPU select."""
    x = x_ref[...].astype(jnp.float32)
    yp = jnp.dot(x, wp_ref[...], preferred_element_type=jnp.float32) + bp_ref[...]
    yv = jnp.dot(x, wv_ref[...], preferred_element_type=jnp.float32) + bv_ref[...]
    row = jax.lax.broadcasted_iota(jnp.int32, yp.shape, 0)
    o_ref[...] = jnp.where(row < n_first, yp, yv).astype(o_ref.dtype)


# -------------------------------- wrapper ------------------------------------
@functools.partial(jax.jit,
                   static_argnames=("data_rep", "njoints", "nfeats", "nframes"))
def output_process(output, params, *, data_rep, njoints, nfeats, nframes):
    """output: (nframes, batch, latent_dim). Linear weights are pre-transposed
    to (in, out); biases are (1, out)."""
    input_feats = njoints * nfeats
    f, b, d = output.shape
    m = f * b
    x2d = output.reshape(m, d)

    spec2d = lambda shp: pl.BlockSpec(shp, lambda i: (0, 0))
    cparams = pltpu.CompilerParams(dimension_semantics=("arbitrary",))

    if data_rep in ("rot6d", "xyz", "hml_vec"):
        wp, bp = params["poseFinal"]
        y2d = pl.pallas_call(
            _linear_kernel,
            out_shape=jax.ShapeDtypeStruct((m, input_feats), output.dtype),
            grid=(1,),
            in_specs=[spec2d((m, d)),
                      spec2d((d, input_feats)),
                      spec2d((1, input_feats))],
            out_specs=spec2d((m, input_feats)),
            compiler_params=cparams,
        )(x2d, wp, bp)
    elif data_rep == "rot_vel":
        wp, bp = params["poseFinal"]
        wv, bv = params["velFinal"]
        y2d = pl.pallas_call(
            functools.partial(_rot_vel_kernel, n_first=b),
            out_shape=jax.ShapeDtypeStruct((m, input_feats), output.dtype),
            grid=(1,),
            in_specs=[spec2d((m, d)),
                      spec2d((d, input_feats)), spec2d((1, input_feats)),
                      spec2d((d, input_feats)), spec2d((1, input_feats))],
            out_specs=spec2d((m, input_feats)),
            compiler_params=cparams,
        )(x2d, wp, bp, wv, bv)
    else:
        raise ValueError(data_rep)

    # Final rearrange is pure layout; done outside the kernel so the kernel
    # stores a dense 2-D slab.
    if input_feats == 3:
        # TODO(synk): '(b f) n d -> b f n d' branch (input_feats == 3) implies a
        # different 3-D input layout; not exercised in this configuration.
        raise NotImplementedError("input_feats == 3 layout path not exercised")
    y = y2d.reshape(f, b, njoints, nfeats)   # 'f b (n d)' -> f b n d
    return jnp.transpose(y, (1, 0, 2, 3))    # -> b f n d


# --------------------------- pure-JAX reference -------------------------------
def reference(output, params, *, data_rep, njoints, nfeats, nframes):
    wp, bp = params["poseFinal"]
    if data_rep in ("rot6d", "xyz", "hml_vec"):
        y = output @ wp + bp[0]
    elif data_rep == "rot_vel":
        wv, bv = params["velFinal"]
        first_pose = output[:1] @ wp + bp[0]
        vel = output[1:] @ wv + bv[0]
        y = jnp.concatenate([first_pose, vel], axis=0)
    else:
        raise ValueError(data_rep)
    f, b, _ = output.shape
    y = y.reshape(f, b, njoints, nfeats)
    return jnp.transpose(y, (1, 0, 2, 3))


# ----------------------------------- main -------------------------------------
if __name__ == "__main__":
    key = jax.random.PRNGKey(0)
    k0, k1, k2, k3, k4 = jax.random.split(key, 5)

    def w(k, shape, s=0.05):
        return (s * jax.random.normal(k, shape)).astype(jnp.float32)

    x = jax.random.normal(k0, (NFRAMES, BATCH, LATENT_DIM), dtype=jnp.float32)
    params = {
        "poseFinal": (w(k1, (LATENT_DIM, INPUT_FEATS)), w(k2, (1, INPUT_FEATS))),
        "velFinal":  (w(k3, (LATENT_DIM, INPUT_FEATS)), w(k4, (1, INPUT_FEATS))),
    }
    cfg = dict(njoints=NJOINTS, nfeats=NFEATS, nframes=NFRAMES)

    for data_rep in ("hml_vec", "rot_vel"):
        out = output_process(x, params, data_rep=data_rep, **cfg)
        out = jax.block_until_ready(out)
        ref = reference(x, params, data_rep=data_rep, **cfg)
        assert out.shape == (BATCH, NFRAMES, NJOINTS, NFEATS)
        assert jnp.allclose(out, ref, atol=1e-5, rtol=1e-5), f"mismatch ({data_rep})"

    print("KERNEL_OK")
</pallas_src>

<mosaic_0001>
module attributes {stable_mosaic.version = 11 : i64} {
  func.func @_linear_kernel(%arg0: i32, %arg1: memref<16x32xf32, #tpu.memory_space<vmem>>, %arg2: memref<32x32xf32, #tpu.memory_space<vmem>>, %arg3: memref<1x32xf32, #tpu.memory_space<vmem>>, %arg4: memref<16x32xf32, #tpu.memory_space<vmem>>) attributes {dimension_semantics = [#tpu.dimension_semantics<arbitrary>], iteration_bounds = array<i64: 1>, scalar_prefetch = 0 : i64, scratch_operands = 0 : i64, tpu.core_type = #tpu.core_type<tc>, window_params = [{pipeline_mode = #tpu.pipeline_mode<synchronous>, transform_indices = @transform_0, window_bounds = array<i64: 16, 32>}, {pipeline_mode = #tpu.pipeline_mode<synchronous>, transform_indices = @transform_1, window_bounds = array<i64: 32, 32>}, {pipeline_mode = #tpu.pipeline_mode<synchronous>, transform_indices = @transform_2, window_bounds = array<i64: 1, 32>}, {pipeline_mode = #tpu.pipeline_mode<synchronous>, transform_indices = @transform_3, window_bounds = array<i64: 16, 32>}]} {
    %c0 = arith.constant 0 : index
    %c0_0 = arith.constant 0 : index
    %0 = vector.load %arg1[%c0, %c0_0] : memref<16x32xf32, #tpu.memory_space<vmem>>, vector<16x32xf32>
    %c0_1 = arith.constant 0 : index
    %c0_2 = arith.constant 0 : index
    %1 = vector.load %arg2[%c0_1, %c0_2] : memref<32x32xf32, #tpu.memory_space<vmem>>, vector<32x32xf32>
    %cst = arith.constant dense<0.000000e+00> : vector<16x32xf32>
    %2 = tpu.matmul %0, %1, %cst {dimension_numbers = #tpu.dot_dimension_numbers<[1], [0], [0], [1], [0, 0, 1, 1], [], []>} : vector<16x32xf32>, vector<32x32xf32>, vector<16x32xf32> -> vector<16x32xf32>
    %c0_3 = arith.constant 0 : index
    %c0_4 = arith.constant 0 : index
    %3 = vector.load %arg3[%c0_3, %c0_4] : memref<1x32xf32, #tpu.memory_space<vmem>>, vector<1x32xf32>
    %4 = vector.broadcast %3 : vector<1x32xf32> to vector<16x32xf32>
    %5 = arith.addf %2, %4 : vector<16x32xf32>
    %c0_5 = arith.constant 0 : index
    %c0_6 = arith.constant 0 : index
    %6 = vector.load %arg4[%c0_5, %c0_6] : memref<16x32xf32, #tpu.memory_space<vmem>>, vector<16x32xf32>
    tpu.vector_store %arg4[%c0_5, %c0_6], %5 {strides = array<i32>} : memref<16x32xf32, #tpu.memory_space<vmem>>, vector<16x32xf32>,
    return
  }
  func.func @transform_0(%arg0: i32) -> (i32, i32) {
    %c0_i32 = arith.constant 0 : i32
    %c0_i32_0 = arith.constant 0 : i32
    %c0_i32_1 = arith.constant 0 : i32
    return %c0_i32, %c0_i32_0 : i32, i32
  }
  func.func @transform_1(%arg0: i32) -> (i32, i32) {
    %c0_i32 = arith.constant 0 : i32
    %c0_i32_0 = arith.constant 0 : i32
    %c0_i32_1 = arith.constant 0 : i32
    return %c0_i32, %c0_i32_0 : i32, i32
  }
  func.func @transform_2(%arg0: i32) -> (i32, i32) {
    %c0_i32 = arith.constant 0 : i32
    %c0_i32_0 = arith.constant 0 : i32
    %c0_i32_1 = arith.constant 0 : i32
    return %c0_i32, %c0_i32_0 : i32, i32
  }
  func.func @transform_3(%arg0: i32) -> (i32, i32) {
    %c0_i32 = arith.constant 0 : i32
    %c0_i32_0 = arith.constant 0 : i32
    %c0_i32_1 = arith.constant 0 : i32
    return %c0_i32, %c0_i32_0 : i32, i32
  }
}

</mosaic_0001>

<bundles_post_ra>
// kernel: output_process.1
= control target key start
LH: loop header
LB: loop body
LE: loop exit
PB: predicated region body
PF: predicated region fallthrough
CT: control target
= control target key end

     0   :  { %8 = vsyncpa [#allocation3], 0  ;;  %s256_s0 = inlined_call_operand.hbm [shape: f32[16,32], index: 0, kind: input, shape index: {}]   ;;  %s257_s1 = inlined_call_operand.hbm [shape: f32[32,32], index: 1, kind: input, shape index: {}]   ;;  %s258_s2 = inlined_call_operand.vmem [shape: f32[1,32], index: 2, kind: input, shape index: {}]   ;;  %s259_s3 = inlined_call_operand.vmem [shape: f32[16,32], index: 3, kind: output, shape index: {}]  }
   0x1   :  { %9 = vsyncpa [#allocation5], 0  ;;  %s213_s12 = smov [#allocation2]  }
   0x2   :  { %s15_s13 = sshll.u32 %s213_s12, 4  ;;  %s16_s13 = int_to_ptr.vmem [resolvable:$true] %s15_s13 }
   0x3   :  { %s177_s14 = scalar_lea.vmem %s16_s13, 256  ;;  %p182_p1 = scmp.lt.s32.totalorder %s16_s13, %s16_s13 }
   0x4   :  { %p178_p0 = scmp.ne.s32.totalorder %s16_s13, %s177_s14  ;;  %p183_p2 = scmp.lt.s32.totalorder %s177_s14, %s177_s14 }
   0x6   :  { %p184_p3 = por %p183_p2, %p182_p1 }
   0x8   :  { %p185_p4 = pnand %p184_p3, %p178_p0 }
   0xa   :  { %188 = shalt.err (!%p185_p4)
}
   0xb   :  { %s214_s15 = smov 128   ;;  %s215_s16 = smov 8  }
   0xc   :  { %21 = dma.hbm_to_vmem [thread:$0]  %s256_s0, 256, %s16_s13, [#allocation3], %s214_s15, %s214_s15, %s215_s16  }
   0xd   :  { %s216_s19 = smov [#allocation4]  }
   0xe   :  { %s27_s20 = sshll.u32 %s216_s19, 4  ;;  %s28_s20 = int_to_ptr.vmem [resolvable:$true] %s27_s20 }
   0xf   :  { %s197_s21 = scalar_lea.vmem %s28_s20, 512  ;;  %p202_p6 = scmp.lt.s32.totalorder %s28_s20, %s28_s20 }
  0x10   :  { %p198_p5 = scmp.ne.s32.totalorder %s28_s20, %s197_s21  ;;  %p203_p7 = scmp.lt.s32.totalorder %s197_s21, %s197_s21 }
  0x12   :  { %p204_p8 = por %p203_p7, %p202_p6 }
  0x14   :  { %p205_p9 = pnand %p204_p8, %p198_p5 }
  0x16   :  { %208 = shalt.err (!%p205_p9)
}
  0x17   :  { %33 = dma.hbm_to_vmem [thread:$0]  %s257_s1, 512, %s28_s20, [#allocation5], %s214_s15, %s214_s15, %s215_s16  }
  0x18   :  { %209 = dma.done.wait [#allocation3], 256  }
  0x19   :  { %210 = vsyncadd [#allocation3], 4294967040 }
  0x1a   :  { %211 = dma.done.wait [#allocation5], 512  }
  0x1b   :  { %212 = vsyncadd [#allocation5], 4294966784  ;;  %vm55_vm0 = vcmask 261120   ;;  %v47_v0 = vld [vmem:[#allocation4 + $0x18] sm:$0xff]  ;;  %v46_v1 = vld [vmem:[#allocation4 + $0x10] sm:$0xff] }
  0x1c   :  { %154 = vmatprep.subr.mxu0 %v47_v0  ;;  %v42_v2 = vld [vmem:[#allocation2] sm:$0xff]  ;;  %v45_v3 = vld [vmem:[#allocation4 + $0x8] sm:$0xff]  ;;  %v44_v4 = vld [vmem:[#allocation4] sm:$0xff] }
  0x1d   :  { %155 = vmatpush3.msra.mxu0 %v47_v0  ;;  %162 = vmatprep.mubr.msk.f32.mxu0 %vm55_vm0, %v42_v2  ;;  %v43_v5 = vld [vmem:[#allocation2 + $0x8] sm:$0xff]  ;;  %v145_v6 = vld [vmem:[%s258_s2] ss:$0 sm:$0xff] }
  0x1e   :  { %156 = vmatprep.subr.mxu0 %v46_v1 }
  0x1f   :  { %157 = vmatpush3.msra.mxu0 %v46_v1 }
  0x20   :  { %158 = vmatprep.subr.mxu0 %v45_v3 }
  0x21   :  { %159 = vmatpush3.msra.mxu0 %v45_v3 }
  0x22   :  { %160 = vmatprep.subr.mxu0 %v44_v4 }
  0x23   :  { %161 = vmatpush3.msra.mxu0 %v44_v4 }
  0x24   :  { %163 = vmatmul.mubr.msk.f32.vlgmr.msra.gmra.mxu0 %vm55_vm0, %v43_v5 }
  0xe4   :  { %v164_v7 = vpop.f32.mrf.mxu0 }
  0xe5   :  { %v134_v8 = vadd.f32 %v164_v7, %v145_v6 }
  0xe6   :  { %v128_v9 = vpop.f32.mrf.mxu0 }
  0xe7   :  { %138 = vst.msk [vmem:[%s259_s3 + $0x8] sm:$0xff] %vm55_vm0, %v134_v8  ;;  %v129_v10 = vadd.f32 %v145_v6, %v128_v9 }
  0xe9   :  { %137 = vst.msk [vmem:[%s259_s3] sm:$0xff] %vm55_vm0, %v129_v10 }
  0xea   :  { %143 = vsyncpa [#allocation3], 1 }
  0xeb   :  { %144 = vsyncpa [#allocation5], 1 }

</bundles_post_ra>
